<compile_context>
chip_gen: v6e
topology: v6e:2x2x1
jax: 0.10.0
libtpu: 0.0.40
codegen_flags: <defaults>
</compile_context>

<pallas_src>
import jax
import jax.numpy as jnp
from jax.experimental import pallas as pl
from jax.experimental.pallas import tpu as pltpu

EPS = 1e-5


def _make_kernel(C: int, H: int, W: int):
    L = H * W
    inv_L = 1.0 / float(L)

    def kernel(x_ref, w1_ref, w2_ref, o_ref):
        # x_ref / o_ref : (1, C, L) VMEM block (one image, spatial flattened)
        # w*_ref        : (3, C, 3C) bf16 VMEM; w[kh][:, kw*C + i] = weight[:, i, kh, kw]
        col = jax.lax.broadcasted_iota(jnp.int32, (1, L), 1) % W
        col_lo = col == 0          # w == 0     -> reflect to w = 1
        col_hi = col == W - 1      # w == W - 1 -> reflect to w = W - 2

        def conv3x3(a, w_ref):
            # a: (C, L) f32 activation. Returns conv3x3(reflect_pad1(a)) in f32.
            # Column (width) taps with reflection, built once per conv.
            r1 = jnp.concatenate([a[:, :1], a[:, :L - 1]], axis=1)   # a[j-1]
            l1 = jnp.concatenate([a[:, 1:], a[:, L - 1:]], axis=1)   # a[j+1]
            c_m1 = jnp.where(col_lo, l1, r1)   # w-1 tap (reflected at w = 0)
            c_p1 = jnp.where(col_hi, r1, l1)   # w+1 tap (reflected at w = W-1)
            # Stack the 3 column taps along the contraction dim -> (3C, L) and
            # cast the MXU operand to bf16 once (accumulation stays f32).
            s = jnp.concatenate([c_m1, a, c_p1], axis=0).astype(jnp.bfloat16)
            # Row (height) shifts with reflection are exact slice+concat in the
            # flat layout and apply uniformly to the stacked slab. Build each
            # shifted slab right before its matmul to limit live VMEM.
            s_up = jnp.concatenate([s[:, W:2 * W], s[:, :L - W]], axis=1)      # h-1
            acc = jnp.dot(w_ref[0], s_up, preferred_element_type=jnp.float32)
            acc = acc + jnp.dot(w_ref[1], s, preferred_element_type=jnp.float32)
            s_dn = jnp.concatenate([s[:, W:], s[:, L - 2 * W:L - W]], axis=1)  # h+1
            acc = acc + jnp.dot(w_ref[2], s_dn, preferred_element_type=jnp.float32)
            return acc

        def instance_norm(y):
            # Single-pass statistics; clamp variance against cancellation.
            mean = jnp.sum(y, axis=1, keepdims=True) * inv_L
            ex2 = jnp.sum(y * y, axis=1, keepdims=True) * inv_L
            var = jnp.maximum(ex2 - mean * mean, 0.0)   # biased var (PyTorch IN)
            return (y - mean) * jax.lax.rsqrt(var + EPS)

        h = instance_norm(conv3x3(x_ref[0].astype(jnp.float32), w1_ref))
        h = jnp.maximum(h, 0.0)                         # ReLU
        h = instance_norm(conv3x3(h, w2_ref))
        # Residual add: re-read the VMEM-resident input block and write the
        # whole (C, L) result with a single lane-dense store.
        o_ref[0] = (x_ref[0].astype(jnp.float32) + h).astype(o_ref.dtype)

    return kernel


def _pack_weight(w, C):
    # OIHW (C_out, C_in, 3, 3) -> (3, C_out, 3*C_in) bf16,
    # columns ordered as [kw=0 | kw=1 | kw=2] blocks of C_in each,
    # matching the (c_m1, a, c_p1) activation stack order.
    wt = jnp.transpose(w.astype(jnp.float32), (2, 0, 3, 1))   # (kh, O, kw, I)
    return wt.reshape(3, C, 3 * C).astype(jnp.bfloat16)


@jax.jit
def residual_block(x, w1, b1, w2, b2):
    # b1 / b2 are accepted for module parity but are mathematically cancelled
    # by the (affine=False) InstanceNorm that follows each conv, so they are
    # not passed to the kernel.
    del b1, b2
    N, C, H, W = x.shape
    L = H * W
    kernel = _make_kernel(C, H, W)

    # Layout plumbing (outside the kernel): flatten spatial dims so the kernel
    # sees lane-dense (C, H*W) slabs; pack conv weights as (3, C, 3C) bf16.
    x_flat = x.reshape(N, C, L)
    w1p = _pack_weight(w1, C)
    w2p = _pack_weight(w2, C)

    out_flat = pl.pallas_call(
        kernel,
        out_shape=jax.ShapeDtypeStruct((N, C, L), x.dtype),
        grid=(N,),
        in_specs=[
            pl.BlockSpec((1, C, L), lambda n: (n, 0, 0)),
            pl.BlockSpec((3, C, 3 * C), lambda n: (0, 0, 0)),
            pl.BlockSpec((3, C, 3 * C), lambda n: (0, 0, 0)),
        ],
        out_specs=pl.BlockSpec((1, C, L), lambda n: (n, 0, 0)),
        compiler_params=pltpu.CompilerParams(
            dimension_semantics=("parallel",),
            vmem_limit_bytes=32 * 1024 * 1024),
    )(x_flat, w1p, w2p)
    return out_flat.reshape(N, C, H, W)


def residual_block_ref(x, w1, b1, w2, b2, eps=EPS):
    """Pure-JAX f32 reference mirroring the PyTorch module."""
    def conv(x, w, b):
        xp = jnp.pad(x, ((0, 0), (0, 0), (1, 1), (1, 1)), mode="reflect")
        y = jax.lax.conv_general_dilated(
            xp, w, window_strides=(1, 1), padding="VALID",
            dimension_numbers=("NCHW", "OIHW", "NCHW"))
        return y + b[None, :, None, None]

    def inorm(y):
        m = y.mean(axis=(2, 3), keepdims=True)
        v = ((y - m) ** 2).mean(axis=(2, 3), keepdims=True)
        return (y - m) / jnp.sqrt(v + eps)

    h = jax.nn.relu(inorm(conv(x, w1, b1)))
    h = inorm(conv(h, w2, b2))
    return x + h


if __name__ == "__main__":
    N, C, H, W = 2, 4, 16, 16
    key = jax.random.PRNGKey(0)
    kx, kw1, kb1, kw2, kb2 = jax.random.split(key, 5)

    x = jax.random.normal(kx, (N, C, H, W), dtype=jnp.float32)
    # Conv2d params: weight (C_out, C_in, 3, 3) OIHW, bias (C,)
    w1 = jax.random.normal(kw1, (C, C, 3, 3), dtype=jnp.float32) * 0.1
    b1 = jax.random.normal(kb1, (C,), dtype=jnp.float32) * 0.1
    w2 = jax.random.normal(kw2, (C, C, 3, 3), dtype=jnp.float32) * 0.1
    b2 = jax.random.normal(kb2, (C,), dtype=jnp.float32) * 0.1

    out = residual_block(x, w1, b1, w2, b2)
    out = jax.block_until_ready(out)

    ref = residual_block_ref(x, w1, b1, w2, b2)
    assert out.shape == (N, C, H, W) and out.dtype == x.dtype
    # Tolerance accounts for bf16 MXU operands (f32 accumulation); structural
    # errors (wrong tap/weight pairing, IN bugs) produce O(0.1..1) deviations.
    assert jnp.allclose(out, ref, atol=5e-2, rtol=5e-2), (
        float(jnp.max(jnp.abs(out - ref))))

    print("KERNEL_OK")
</pallas_src>

<mosaic_0001>
module attributes {stable_mosaic.version = 11 : i64} {
  func.func @kernel(%arg0: i32, %arg1: memref<1x4x256xf32, #tpu.memory_space<vmem>>, %arg2: memref<3x4x12xbf16, #tpu.memory_space<vmem>>, %arg3: memref<3x4x12xbf16, #tpu.memory_space<vmem>>, %arg4: memref<1x4x256xf32, #tpu.memory_space<vmem>>) attributes {dimension_semantics = [#tpu.dimension_semantics<parallel>], iteration_bounds = array<i64: 2>, scalar_prefetch = 0 : i64, scratch_operands = 0 : i64, tpu.core_type = #tpu.core_type<tc>, window_params = [{transform_indices = @transform_0, window_bounds = array<i64: 1, 4, 256>}, {pipeline_mode = #tpu.pipeline_mode<synchronous>, transform_indices = @transform_1, window_bounds = array<i64: 3, 4, 12>}, {pipeline_mode = #tpu.pipeline_mode<synchronous>, transform_indices = @transform_2, window_bounds = array<i64: 3, 4, 12>}, {transform_indices = @transform_3, window_bounds = array<i64: 1, 4, 256>}]} {
    %0 = tpu.iota {dimensions = array<i32: 1>} : vector<1x256xi32>
    %c16_i32 = arith.constant 16 : i32
    %c0_i32 = arith.constant 0 : i32
    %1 = arith.cmpi eq, %c16_i32, %c0_i32 : i32
    %c1_i32 = arith.constant 1 : i32
    %2 = arith.select %1, %c1_i32, %c16_i32 : i32
    %3 = vector.broadcast %2 : i32 to vector<1x256xi32>
    %4 = arith.remsi %0, %3 : vector<1x256xi32>
    %c0_i32_0 = arith.constant 0 : i32
    %5 = vector.broadcast %c0_i32_0 : i32 to vector<1x256xi32>
    %6 = arith.cmpi ne, %4, %5 : vector<1x256xi32>
    %c0_i32_1 = arith.constant 0 : i32
    %7 = vector.broadcast %c0_i32_1 : i32 to vector<1x256xi32>
    %8 = arith.cmpi slt, %4, %7 : vector<1x256xi32>
    %c0_i32_2 = arith.constant 0 : i32
    %9 = arith.cmpi slt, %2, %c0_i32_2 : i32
    %10 = vector.broadcast %9 : i1 to vector<1x256xi1>
    %11 = vector.broadcast %10 : vector<1x256xi1> to vector<1x256xi1>
    %12 = arith.xori %8, %11 : vector<1x256xi1>
    %13 = arith.andi %12, %6 : vector<1x256xi1>
    %14 = vector.broadcast %2 : i32 to vector<1x256xi32>
    %15 = arith.addi %4, %14 : vector<1x256xi32>
    %16 = arith.select %13, %15, %4 : vector<1x256xi1>, vector<1x256xi32>
    %c0_i32_3 = arith.constant 0 : i32
    %17 = vector.broadcast %c0_i32_3 : i32 to vector<1x256xi32>
    %18 = arith.cmpi eq, %16, %17 : vector<1x256xi32>
    %c15_i32 = arith.constant 15 : i32
    %19 = vector.broadcast %c15_i32 : i32 to vector<1x256xi32>
    %20 = arith.cmpi eq, %16, %19 : vector<1x256xi32>
    %c0 = arith.constant 0 : index
    %c0_4 = arith.constant 0 : index
    %c0_5 = arith.constant 0 : index
    %21 = vector.load %arg1[%c0, %c0_4, %c0_5] : memref<1x4x256xf32, #tpu.memory_space<vmem>>, vector<1x4x256xf32>
    %22 = vector.shape_cast %21 : vector<1x4x256xf32> to vector<4x256xf32>
    %23 = vector.extract_strided_slice %22 {offsets = [0, 0], sizes = [4, 1], strides = [1, 1]} : vector<4x256xf32> to vector<4x1xf32>
    %24 = vector.extract_strided_slice %22 {offsets = [0, 0], sizes = [4, 255], strides = [1, 1]} : vector<4x256xf32> to vector<4x255xf32>
    %25 = tpu.concatenate %23, %24 in 1 : vector<4x1xf32>, vector<4x255xf32> -> vector<4x256xf32>
    %26 = vector.extract_strided_slice %22 {offsets = [0, 1], sizes = [4, 255], strides = [1, 1]} : vector<4x256xf32> to vector<4x255xf32>
    %27 = vector.extract_strided_slice %22 {offsets = [0, 255], sizes = [4, 1], strides = [1, 1]} : vector<4x256xf32> to vector<4x1xf32>
    %28 = tpu.concatenate %26, %27 in 1 : vector<4x255xf32>, vector<4x1xf32> -> vector<4x256xf32>
    %29 = vector.shape_cast %18 : vector<1x256xi1> to vector<1x256xi1>
    %30 = vector.broadcast %29 : vector<1x256xi1> to vector<4x256xi1>
    %31 = arith.select %30, %28, %25 : vector<4x256xi1>, vector<4x256xf32>
    %32 = vector.shape_cast %20 : vector<1x256xi1> to vector<1x256xi1>
    %33 = vector.broadcast %32 : vector<1x256xi1> to vector<4x256xi1>
    %34 = arith.select %33, %25, %28 : vector<4x256xi1>, vector<4x256xf32>
    %35 = tpu.concatenate %31, %22, %34 in 0 : vector<4x256xf32>, vector<4x256xf32>, vector<4x256xf32> -> vector<12x256xf32>
    %36 = arith.truncf %35 : vector<12x256xf32> to vector<12x256xbf16>
    %37 = vector.extract_strided_slice %36 {offsets = [0, 16], sizes = [12, 16], strides = [1, 1]} : vector<12x256xbf16> to vector<12x16xbf16>
    %38 = vector.extract_strided_slice %36 {offsets = [0, 0], sizes = [12, 240], strides = [1, 1]} : vector<12x256xbf16> to vector<12x240xbf16>
    %39 = tpu.concatenate %37, %38 in 1 : vector<12x16xbf16>, vector<12x240xbf16> -> vector<12x256xbf16>
    %c0_6 = arith.constant 0 : index
    %c0_7 = arith.constant 0 : index
    %c0_8 = arith.constant 0 : index
    %40 = vector.load %arg2[%c0_6, %c0_7, %c0_8] : memref<3x4x12xbf16, #tpu.memory_space<vmem>>, vector<1x4x12xbf16>
    %41 = vector.shape_cast %40 : vector<1x4x12xbf16> to vector<4x12xbf16>
    %cst = arith.constant dense<0.000000e+00> : vector<4x256xf32>
    %42 = tpu.matmul %41, %39, %cst {dimension_numbers = #tpu.dot_dimension_numbers<[1], [0], [0], [1], [0, 0, 1, 1], [], []>} : vector<4x12xbf16>, vector<12x256xbf16>, vector<4x256xf32> -> vector<4x256xf32>
    %c1 = arith.constant 1 : index
    %c0_9 = arith.constant 0 : index
    %c0_10 = arith.constant 0 : index
    %43 = vector.load %arg2[%c1, %c0_9, %c0_10] : memref<3x4x12xbf16, #tpu.memory_space<vmem>>, vector<1x4x12xbf16>
    %44 = vector.shape_cast %43 : vector<1x4x12xbf16> to vector<4x12xbf16>
    %cst_11 = arith.constant dense<0.000000e+00> : vector<4x256xf32>
    %45 = tpu.matmul %44, %36, %cst_11 {dimension_numbers = #tpu.dot_dimension_numbers<[1], [0], [0], [1], [0, 0, 1, 1], [], []>} : vector<4x12xbf16>, vector<12x256xbf16>, vector<4x256xf32> -> vector<4x256xf32>
    %46 = arith.addf %42, %45 : vector<4x256xf32>
    %47 = vector.extract_strided_slice %36 {offsets = [0, 16], sizes = [12, 240], strides = [1, 1]} : vector<12x256xbf16> to vector<12x240xbf16>
    %48 = vector.extract_strided_slice %36 {offsets = [0, 224], sizes = [12, 16], strides = [1, 1]} : vector<12x256xbf16> to vector<12x16xbf16>
    %49 = tpu.concatenate %47, %48 in 1 : vector<12x240xbf16>, vector<12x16xbf16> -> vector<12x256xbf16>
    %c2 = arith.constant 2 : index
    %c0_12 = arith.constant 0 : index
    %c0_13 = arith.constant 0 : index
    %50 = vector.load %arg2[%c2, %c0_12, %c0_13] : memref<3x4x12xbf16, #tpu.memory_space<vmem>>, vector<1x4x12xbf16>
    %51 = vector.shape_cast %50 : vector<1x4x12xbf16> to vector<4x12xbf16>
    %cst_14 = arith.constant dense<0.000000e+00> : vector<4x256xf32>
    %52 = tpu.matmul %51, %49, %cst_14 {dimension_numbers = #tpu.dot_dimension_numbers<[1], [0], [0], [1], [0, 0, 1, 1], [], []>} : vector<4x12xbf16>, vector<12x256xbf16>, vector<4x256xf32> -> vector<4x256xf32>
    %53 = arith.addf %46, %52 : vector<4x256xf32>
    %cst_15 = arith.constant dense<0.000000e+00> : vector<4xf32>
    %54 = vector.multi_reduction <add>, %53, %cst_15 [1] : vector<4x256xf32> to vector<4xf32>
    %55 = vector.shape_cast %54 : vector<4xf32> to vector<4x1xf32>
    %cst_16 = arith.constant 3.906250e-03 : f32
    %56 = vector.broadcast %cst_16 : f32 to vector<4x1xf32>
    %57 = arith.mulf %55, %56 : vector<4x1xf32>
    %58 = arith.mulf %53, %53 : vector<4x256xf32>
    %cst_17 = arith.constant dense<0.000000e+00> : vector<4xf32>
    %59 = vector.multi_reduction <add>, %58, %cst_17 [1] : vector<4x256xf32> to vector<4xf32>
    %60 = vector.shape_cast %59 : vector<4xf32> to vector<4x1xf32>
    %cst_18 = arith.constant 3.906250e-03 : f32
    %61 = vector.broadcast %cst_18 : f32 to vector<4x1xf32>
    %62 = arith.mulf %60, %61 : vector<4x1xf32>
    %63 = arith.mulf %57, %57 : vector<4x1xf32>
    %64 = arith.subf %62, %63 : vector<4x1xf32>
    %cst_19 = arith.constant 0.000000e+00 : f32
    %65 = vector.broadcast %cst_19 : f32 to vector<4x1xf32>
    %66 = arith.maximumf %64, %65 : vector<4x1xf32>
    %67 = vector.broadcast %57 : vector<4x1xf32> to vector<4x256xf32>
    %68 = arith.subf %53, %67 : vector<4x256xf32>
    %cst_20 = arith.constant 9.99999974E-6 : f32
    %69 = vector.broadcast %cst_20 : f32 to vector<4x1xf32>
    %70 = arith.addf %66, %69 : vector<4x1xf32>
    %71 = math.rsqrt %70 : vector<4x1xf32>
    %72 = vector.broadcast %71 : vector<4x1xf32> to vector<4x256xf32>
    %73 = arith.mulf %68, %72 : vector<4x256xf32>
    %cst_21 = arith.constant 0.000000e+00 : f32
    %74 = vector.broadcast %cst_21 : f32 to vector<4x256xf32>
    %75 = arith.maximumf %73, %74 : vector<4x256xf32>
    %76 = vector.extract_strided_slice %75 {offsets = [0, 0], sizes = [4, 1], strides = [1, 1]} : vector<4x256xf32> to vector<4x1xf32>
    %77 = vector.extract_strided_slice %75 {offsets = [0, 0], sizes = [4, 255], strides = [1, 1]} : vector<4x256xf32> to vector<4x255xf32>
    %78 = tpu.concatenate %76, %77 in 1 : vector<4x1xf32>, vector<4x255xf32> -> vector<4x256xf32>
    %79 = vector.extract_strided_slice %75 {offsets = [0, 1], sizes = [4, 255], strides = [1, 1]} : vector<4x256xf32> to vector<4x255xf32>
    %80 = vector.extract_strided_slice %75 {offsets = [0, 255], sizes = [4, 1], strides = [1, 1]} : vector<4x256xf32> to vector<4x1xf32>
    %81 = tpu.concatenate %79, %80 in 1 : vector<4x255xf32>, vector<4x1xf32> -> vector<4x256xf32>
    %82 = vector.shape_cast %18 : vector<1x256xi1> to vector<1x256xi1>
    %83 = vector.broadcast %82 : vector<1x256xi1> to vector<4x256xi1>
    %84 = arith.select %83, %81, %78 : vector<4x256xi1>, vector<4x256xf32>
    %85 = vector.shape_cast %20 : vector<1x256xi1> to vector<1x256xi1>
    %86 = vector.broadcast %85 : vector<1x256xi1> to vector<4x256xi1>
    %87 = arith.select %86, %78, %81 : vector<4x256xi1>, vector<4x256xf32>
    %88 = tpu.concatenate %84, %75, %87 in 0 : vector<4x256xf32>, vector<4x256xf32>, vector<4x256xf32> -> vector<12x256xf32>
    %89 = arith.truncf %88 : vector<12x256xf32> to vector<12x256xbf16>
    %90 = vector.extract_strided_slice %89 {offsets = [0, 16], sizes = [12, 16], strides = [1, 1]} : vector<12x256xbf16> to vector<12x16xbf16>
    %91 = vector.extract_strided_slice %89 {offsets = [0, 0], sizes = [12, 240], strides = [1, 1]} : vector<12x256xbf16> to vector<12x240xbf16>
    %92 = tpu.concatenate %90, %91 in 1 : vector<12x16xbf16>, vector<12x240xbf16> -> vector<12x256xbf16>
    %c0_22 = arith.constant 0 : index
    %c0_23 = arith.constant 0 : index
    %c0_24 = arith.constant 0 : index
    %93 = vector.load %arg3[%c0_22, %c0_23, %c0_24] : memref<3x4x12xbf16, #tpu.memory_space<vmem>>, vector<1x4x12xbf16>
    %94 = vector.shape_cast %93 : vector<1x4x12xbf16> to vector<4x12xbf16>
    %cst_25 = arith.constant dense<0.000000e+00> : vector<4x256xf32>
    %95 = tpu.matmul %94, %92, %cst_25 {dimension_numbers = #tpu.dot_dimension_numbers<[1], [0], [0], [1], [0, 0, 1, 1], [], []>} : vector<4x12xbf16>, vector<12x256xbf16>, vector<4x256xf32> -> vector<4x256xf32>
    %c1_26 = arith.constant 1 : index
    %c0_27 = arith.constant 0 : index
    %c0_28 = arith.constant 0 : index
    %96 = vector.load %arg3[%c1_26, %c0_27, %c0_28] : memref<3x4x12xbf16, #tpu.memory_space<vmem>>, vector<1x4x12xbf16>
    %97 = vector.shape_cast %96 : vector<1x4x12xbf16> to vector<4x12xbf16>
    %cst_29 = arith.constant dense<0.000000e+00> : vector<4x256xf32>
    %98 = tpu.matmul %97, %89, %cst_29 {dimension_numbers = #tpu.dot_dimension_numbers<[1], [0], [0], [1], [0, 0, 1, 1], [], []>} : vector<4x12xbf16>, vector<12x256xbf16>, vector<4x256xf32> -> vector<4x256xf32>
    %99 = arith.addf %95, %98 : vector<4x256xf32>
    %100 = vector.extract_strided_slice %89 {offsets = [0, 16], sizes = [12, 240], strides = [1, 1]} : vector<12x256xbf16> to vector<12x240xbf16>
    %101 = vector.extract_strided_slice %89 {offsets = [0, 224], sizes = [12, 16], strides = [1, 1]} : vector<12x256xbf16> to vector<12x16xbf16>
    %102 = tpu.concatenate %100, %101 in 1 : vector<12x240xbf16>, vector<12x16xbf16> -> vector<12x256xbf16>
    %c2_30 = arith.constant 2 : index
    %c0_31 = arith.constant 0 : index
    %c0_32 = arith.constant 0 : index
    %103 = vector.load %arg3[%c2_30, %c0_31, %c0_32] : memref<3x4x12xbf16, #tpu.memory_space<vmem>>, vector<1x4x12xbf16>
    %104 = vector.shape_cast %103 : vector<1x4x12xbf16> to vector<4x12xbf16>
    %cst_33 = arith.constant dense<0.000000e+00> : vector<4x256xf32>
    %105 = tpu.matmul %104, %102, %cst_33 {dimension_numbers = #tpu.dot_dimension_numbers<[1], [0], [0], [1], [0, 0, 1, 1], [], []>} : vector<4x12xbf16>, vector<12x256xbf16>, vector<4x256xf32> -> vector<4x256xf32>
    %106 = arith.addf %99, %105 : vector<4x256xf32>
    %cst_34 = arith.constant dense<0.000000e+00> : vector<4xf32>
    %107 = vector.multi_reduction <add>, %106, %cst_34 [1] : vector<4x256xf32> to vector<4xf32>
    %108 = vector.shape_cast %107 : vector<4xf32> to vector<4x1xf32>
    %cst_35 = arith.constant 3.906250e-03 : f32
    %109 = vector.broadcast %cst_35 : f32 to vector<4x1xf32>
    %110 = arith.mulf %108, %109 : vector<4x1xf32>
    %111 = arith.mulf %106, %106 : vector<4x256xf32>
    %cst_36 = arith.constant dense<0.000000e+00> : vector<4xf32>
    %112 = vector.multi_reduction <add>, %111, %cst_36 [1] : vector<4x256xf32> to vector<4xf32>
    %113 = vector.shape_cast %112 : vector<4xf32> to vector<4x1xf32>
    %cst_37 = arith.constant 3.906250e-03 : f32
    %114 = vector.broadcast %cst_37 : f32 to vector<4x1xf32>
    %115 = arith.mulf %113, %114 : vector<4x1xf32>
    %116 = arith.mulf %110, %110 : vector<4x1xf32>
    %117 = arith.subf %115, %116 : vector<4x1xf32>
    %cst_38 = arith.constant 0.000000e+00 : f32
    %118 = vector.broadcast %cst_38 : f32 to vector<4x1xf32>
    %119 = arith.maximumf %117, %118 : vector<4x1xf32>
    %120 = vector.broadcast %110 : vector<4x1xf32> to vector<4x256xf32>
    %121 = arith.subf %106, %120 : vector<4x256xf32>
    %cst_39 = arith.constant 9.99999974E-6 : f32
    %122 = vector.broadcast %cst_39 : f32 to vector<4x1xf32>
    %123 = arith.addf %119, %122 : vector<4x1xf32>
    %124 = math.rsqrt %123 : vector<4x1xf32>
    %125 = vector.broadcast %124 : vector<4x1xf32> to vector<4x256xf32>
    %126 = arith.mulf %121, %125 : vector<4x256xf32>
    %c0_40 = arith.constant 0 : index
    %c0_41 = arith.constant 0 : index
    %c0_42 = arith.constant 0 : index
    %127 = vector.load %arg1[%c0_40, %c0_41, %c0_42] : memref<1x4x256xf32, #tpu.memory_space<vmem>>, vector<1x4x256xf32>
    %128 = vector.shape_cast %127 : vector<1x4x256xf32> to vector<4x256xf32>
    %129 = arith.addf %128, %126 : vector<4x256xf32>
    %c0_43 = arith.constant 0 : index
    %c0_44 = arith.constant 0 : index
    %c0_45 = arith.constant 0 : index
    %130 = vector.load %arg4[%c0_43, %c0_44, %c0_45] : memref<1x4x256xf32, #tpu.memory_space<vmem>>, vector<1x4x256xf32>
    %131 = vector.shape_cast %130 : vector<1x4x256xf32> to vector<4x256xf32>
    %132 = vector.shape_cast %129 : vector<4x256xf32> to vector<1x4x256xf32>
    tpu.vector_store %arg4[%c0_43, %c0_44, %c0_45], %132 {strides = array<i32>} : memref<1x4x256xf32, #tpu.memory_space<vmem>>, vector<1x4x256xf32>,
    return
  }
  func.func @transform_0(%arg0: i32) -> (i32, i32, i32) {
    %c0_i32 = arith.constant 0 : i32
    %c0_i32_0 = arith.constant 0 : i32
    %c0_i32_1 = arith.constant 0 : i32
    return %arg0, %c0_i32, %c0_i32_0 : i32, i32, i32
  }
  func.func @transform_1(%arg0: i32) -> (i32, i32, i32) {
    %c0_i32 = arith.constant 0 : i32
    %c0_i32_0 = arith.constant 0 : i32
    %c0_i32_1 = arith.constant 0 : i32
    %c0_i32_2 = arith.constant 0 : i32
    return %c0_i32, %c0_i32_0, %c0_i32_1 : i32, i32, i32
  }
  func.func @transform_2(%arg0: i32) -> (i32, i32, i32) {
    %c0_i32 = arith.constant 0 : i32
    %c0_i32_0 = arith.constant 0 : i32
    %c0_i32_1 = arith.constant 0 : i32
    %c0_i32_2 = arith.constant 0 : i32
    return %c0_i32, %c0_i32_0, %c0_i32_1 : i32, i32, i32
  }
  func.func @transform_3(%arg0: i32) -> (i32, i32, i32) {
    %c0_i32 = arith.constant 0 : i32
    %c0_i32_0 = arith.constant 0 : i32
    %c0_i32_1 = arith.constant 0 : i32
    return %arg0, %c0_i32, %c0_i32_0 : i32, i32, i32
  }
}

</mosaic_0001>

<bundles_post_ra>
// kernel: residual_block.1
= control target key start
LH: loop header
LB: loop body
LE: loop exit
PB: predicated region body
PF: predicated region fallthrough
CT: control target
= control target key end

     0   :  { %s836_s12 = smov 0   ;;  %s984_s0 = inlined_call_operand.vmem [shape: f32[2,4,256], index: 0, kind: input, shape index: {}]   ;;  %s985_s1 = inlined_call_operand.vmem [shape: bf16[3,4,12], index: 1, kind: input, shape index: {}]   ;;  %s986_s2 = inlined_call_operand.vmem [shape: bf16[3,4,12], index: 2, kind: input, shape index: {}]   ;;  %s987_s3 = inlined_call_operand.vmem [shape: f32[2,4,256], index: 3, kind: output, shape index: {}]  }
   0x1 LB: > { %s735_s13 = sadd.s32 4294967295, %s809_s12   ;;  %p739_p0 = scmp.ge.s32.totalorder %s809_s12, 1  ;;  %s809_s12 = sphi %s836_s12, %s13_s12  }
   0x2   : > { %p137_p1 = scmp.lt.s32.totalorder %s809_s12, 3 }
   0x4   : > { %p138_p2 = pnand %p739_p0, %p137_p1 }
   0x5   : > { %p161_p3 = scmp.lt.s32.totalorder (!%p138_p2), %s735_s13, 1  ;;  %s811_s18 = smov (!%p138_p2), 1  }
   0x6   : > { %141 = sbr.rel (%p138_p2) target bundleno = 1259 (0x4eb), region = 32  ;;  %s812_s19 = smov (!%p138_p2), 127  }
   0x7   : > { %s814_s20 = smov (!%p138_p2), 112   ;;  %s815_s21 = smov (!%p138_p2), 16  }
   0xb   : > { %s997_s13 = smov (!%p161_p3, %s735_s13), 1  ;;  %v813_v3 = vmov 0   ;;  %v172_v4 = vlaneseq  ;;  %vm210_vm0 = vcmask 7168   ;;  %vm219_vm1 = vcmask 1039360   ;;  %v744_v33 = vld [vmem:[%s985_s1 + $0x2] sm:$0x3] }
   0xc   : > { %s762_s14 = sshll.u32 %s997_s13, 3  ;;  %304 = vmatprep.mubr.bf16.mxu0 %v813_v3  ;;  %353 = vmatprep.mubr.bf16.mxu1 %v813_v3  ;;  %vm239_vm6 = vcmask 1043456   ;;  %vm265_vm7 = vcmask 1045504   ;;  %vm261_vm8 = vcmask 97280   ;;  %vm252_vm9 = vcmask 130048  }
   0xd   : > { %s165_s17 = scalar_lea.vmem %s984_s0, %s762_s14  ;;  %v173_v5 = vand.u32 127, %v172_v4  ;;  %vm364_vm10 = vcmask 916480   ;;  %v258_v40 = vld [vmem:[%s985_s1] sm:$0x3]  ;;  %v749_v45 = vld [vmem:[%s985_s1 + $0x4] sm:$0x3]  ;;  %s170_s9 = scalar_lea.vmem %s987_s3, %s762_s14 }
   0xe   : > { %v852_v0 = vld [vmem:[%s165_s17] sm:$0xff] }
   0xf   : > { %v205_v1 = vcombine.high %v852_v0, %v852_v0  ;;  %v174_v6 = vadd.s32 128, %v173_v5  ;;  %v179_v8 = vand.u32 15, %v173_v5  ;;  %v237_v15 = vcombine.low %v852_v0, %v852_v0  ;;  %v752_v13 = vld [vmem:[%s986_s2 + $0x2] sm:$0x3] }
  0x11   : > { %v777_v2 = vpack.i.bf16 %v205_v1, %v852_v0  ;;  %v186_v9 = vand.u32 15, %v174_v6  ;;  %vm861_vm2 = vcmp.eq.s32.totalorder %v179_v8, 0  ;;  %vm865_vm3 = vcmp.eq.s32.totalorder %v179_v8, 15 }
  0x13   : > { %778 = vrot.lane.b32.xlu0 %v777_v2, %s811_s18  ;;  %vm871_vm4 = vcmp.eq.s32.totalorder %v186_v9, 0  ;;  %vm875_vm5 = vcmp.eq.s32.totalorder %v186_v9, 15 }
  0x17   : > { %783 = vrot.lane.b32.xlu0 %v777_v2, %s812_s19 }
  0x85   : > { %v779_v7 = vpop.permute.xlu0 %778 }
  0x86   : > { %v781_v10 = vunpack.i.h.bf16 %v779_v7  ;;  %v780_v11 = vunpack.i.l.bf16 %v779_v7 }
  0x88   : > { %v211_v20 = vsel %vm210_vm0, %v780_v11, %v781_v10  ;;  %v214_v21 = vsel %vm210_vm0, %v852_v0, %v780_v11 }
  0x89   : > { %v784_v12 = vpop.permute.xlu0 %783 }
  0x8a   : > { %v786_v16 = vunpack.i.h.bf16 %v784_v12  ;;  %v785_v17 = vunpack.i.l.bf16 %v784_v12 }
  0x8c   : > { %v224_v22 = vsel %vm219_vm1, %v786_v16, %v205_v1  ;;  %v220_v23 = vsel %vm219_vm1, %v785_v17, %v786_v16 }
  0x8d   : > { %v229_v24 = vsel %vm861_vm2, %v220_v23, %v214_v21  ;;  %v235_v25 = vsel %vm865_vm3, %v214_v21, %v220_v23  ;;  %v230_v26 = vsel %vm871_vm4, %v224_v22, %v211_v20  ;;  %v236_v27 = vsel %vm875_vm5, %v211_v20, %v224_v22 }
  0x8e   : > { %v240_v28 = vsel %vm239_vm6, %v229_v24, %v237_v15  ;;  %v241_v29 = vsel %vm239_vm6, %v230_v26, %v852_v0 }
  0x8f   : > { %v242_v30 = vpack.c.bf16 %v235_v25, %v240_v28  ;;  %v243_v31 = vpack.c.bf16 %v236_v27, %v241_v29 }
  0x91   : > { %245 = vrot.lane.b32.xlu1 %v242_v30, %s814_s20  ;;  %250 = vrot.lane.b32.xlu0 %v243_v31, %s815_s21  ;;  %v267_v32 = vsel %vm265_vm7, %v242_v30, 0 }
  0x92   : > { %745 = vmatprep.subr.msk.bf16.mxu0 %vm265_vm7, %v243_v31 }
  0x93   : > { %287 = vmatpush1.bf16.msra.mxu0 %v267_v32 }
  0x95   : > { %248 = vrot.lane.b32.xlu1 %v242_v30, %s815_s21 }
  0x96   : > { %746 = vmatmul.mubr.msk.bf16.vlgmr.msra.gmra.mxu0 %vm261_vm8, %v744_v33 }
  0x97   : > { %412 = vmatprep.mubr.bf16.mxu0 %v813_v3 }
  0x99   : > { %362 = vrot.lane.b32.xlu1 %v243_v31, %s814_s20 }
 0x103   : > { %v246_v34 = vpop.permute.xlu1 %245  ;;  %v251_v35 = vpop.permute.xlu0 %250 }
 0x107   : > { %v249_v36 = vpop.permute.xlu1 %248 }
 0x108   : > { %v253_v37 = vsel %vm252_vm9, %v249_v36, %v251_v35  ;;  %v257_v38 = vsel %vm252_vm9, %v246_v34, %v249_v36 }
 0x109   : > { %747 = vmatprep.subr.msk.bf16.mxu1 %vm265_vm7, %v253_v37  ;;  %v316_v39 = vsel %vm265_vm7, %v257_v38, 0 }
 0x10a   : > { %336 = vmatpush1.bf16.msra.mxu1 %v316_v39 }
 0x10b   : > { %v363_v41 = vpop.permute.xlu1 %362 }
 0x10c   : > { %v365_v42 = vsel %vm364_vm10, %v246_v34, %v363_v41  ;;  %v369_v43 = vsel %vm364_vm10, %v363_v41, %v251_v35 }
 0x10d   : > { %v376_v44 = vsel %vm265_vm7, %v365_v42, 0  ;;  %748 = vmatmul.mubr.msk.bf16.vlgmr.msra.gmra.mxu1 %vm261_vm8, %v258_v40  ;;  %750 = vmatprep.subr.msk.bf16.mxu0 %vm265_vm7, %v369_v43 }
 0x10e   : > { %395 = vmatpush1.bf16.msra.mxu0 %v376_v44  ;;  %534 = vmatprep.mubr.bf16.mxu1 %v813_v3 }
 0x111   : > { %751 = vmatmul.mubr.msk.bf16.vlgmr.msra.gmra.mxu0 %vm261_vm8, %v749_v45 }
 0x112   : > { %583 = vmatprep.mubr.bf16.mxu0 %v813_v3 }
 0x156   : > { %v306_v46 = vpop.f32.mrf.mxu0 }
 0x158   : > { %v308_v47 = vpop.f32.mrf.mxu0 }
 0x15a   : > { %v310_v48 = vpop.f32.mrf.mxu0 }
 0x15c   : > { %v311_v49 = vpop.f32.mrf.mxu0 }
 0x1cd   : > { %v355_v50 = vpop.f32.mrf.mxu1 }
 0x1ce   : > { %v356_v52 = vadd.f32 %v355_v50, %v306_v46 }
 0x1cf   : > { %v357_v51 = vpop.f32.mrf.mxu1 }
 0x1d0   : > { %v358_v55 = vadd.f32 %v357_v51, %v308_v47 }
 0x1d1   : > { %v359_v53 = vpop.f32.mrf.mxu1  ;;  %v414_v54 = vpop.f32.mrf.mxu0 }
 0x1d2   : > { %v421_v56 = vadd.f32 %v414_v54, %v356_v52 }
 0x1d3   : > { %v360_v57 = vpop.f32.mrf.mxu1  ;;  %v416_v58 = vpop.f32.mrf.mxu0 }
 0x1d4   : > { %v422_v59 = vadd.f32 %v416_v58, %v358_v55  ;;  %v429_v60 = vmul.f32 %v421_v56, %v421_v56  ;;  %v423_v62 = vsel %vm239_vm6, %v421_v56, 0.0 }
 0x1d5   : > { %v418_v61 = vpop.f32.mrf.mxu0 }
 0x1d6   : > { %v424_v63 = vsel %vm239_vm6, %v422_v59, 0.0  ;;  %v430_v1 = vmul.f32 %v422_v59, %v422_v59  ;;  %v431_v5 = vsel %vm239_vm6, %v429_v60, 0.0 }
 0x1d7   : > { %v419_v2 = vpop.f32.mrf.mxu0  ;;  %v425_v4 = vadd.f32 %v424_v63, %v423_v62 }
 0x1d8   : > { %v432_v6 = vsel %vm239_vm6, %v430_v1, 0.0 }
 0x1d9   : > { %426 = vadd.xlane.f32.xlu0 %v425_v4  ;;  %v433_v7 = vadd.f32 %v432_v6, %v431_v5 }
 0x1db   : > { %434 = vadd.xlane.f32.xlu1 %v433_v7 }
 0x262   : > { %v427_v8 = vpop.xlane.xlu0 %426 }
 0x263   : > { %v428_v9 = vmul.f32 0.00390625, %v427_v8 }
 0x264   : > { %v435_v10 = vpop.xlane.xlu1 %434 }
 0x265   : > { %v436_v11 = vmul.f32 0.00390625, %v435_v10  ;;  %v437_v12 = vmul.f32 %v428_v9, %v428_v9  ;;  %v440_v20 = vsub.f32 %v421_v56, %v428_v9  ;;  %v441_v21 = vsub.f32 %v422_v59, %v428_v9  ;;  %v757_v56 = vld [vmem:[%s986_s2 + $0x4] sm:$0x3] }
 0x267   : > { %v438_v15 = vsub.f32 %v436_v11, %v437_v12 }
 0x269   : > { %v439_v16 = vmax.f32 %v438_v15, 0.0 }
 0x26b   : > { %v442_v17 = vadd.f32 1e-05, %v439_v16 }
 0x26d   : > { %799 = vrsqrt.f32 %v442_v17 }
 0x27a   : > { %v800_v22 = vpop.eup %799 }
 0x27b   : > { %v444_v23 = vmul.f32 %v800_v22, %v440_v20  ;;  %v445_v24 = vmul.f32 %v800_v22, %v441_v21 }
 0x27d   : > { %v446_v25 = vmax.f32 %v444_v23, 0.0  ;;  %v447_v26 = vmax.f32 %v445_v24, 0.0 }
 0x27f   : > { %v792_v27 = vpack.i.bf16 %v447_v26, %v446_v25  ;;  %v471_v34 = vrot.slane %v447_v26, 4  ;;  %v470_v35 = vrot.slane %v446_v25, 4 }
 0x281   : > { %793 = vrot.lane.b32.xlu1 %v792_v27, %s812_s19  ;;  %788 = vrot.lane.b32.xlu0 %v792_v27, %s811_s18 }
 0x2f3   : > { %v794_v28 = vpop.permute.xlu1 %793  ;;  %v789_v29 = vpop.permute.xlu0 %788 }
 0x2f4   : > { %v796_v30 = vunpack.i.h.bf16 %v794_v28  ;;  %v795_v31 = vunpack.i.l.bf16 %v794_v28  ;;  %v791_v32 = vunpack.i.h.bf16 %v789_v29  ;;  %v790_v33 = vunpack.i.l.bf16 %v789_v29 }
 0x2f6   : > { %v465_v36 = vsel %vm219_vm1, %v796_v30, %v447_v26  ;;  %v462_v37 = vsel %vm219_vm1, %v795_v31, %v796_v30  ;;  %v454_v38 = vsel %vm210_vm0, %v790_v33, %v791_v32  ;;  %v457_v39 = vsel %vm210_vm0, %v446_v25, %v790_v33 }
 0x2f7   : > { %v467_v40 = vsel %vm871_vm4, %v465_v36, %v454_v38  ;;  %v469_v41 = vsel %vm875_vm5, %v454_v38, %v465_v36  ;;  %v466_v42 = vsel %vm861_vm2, %v462_v37, %v457_v39  ;;  %v468_v43 = vsel %vm865_vm3, %v457_v39, %v462_v37 }
 0x2f8   : > { %v475_v44 = vsel %vm239_vm6, %v467_v40, %v471_v34  ;;  %v474_v45 = vsel %vm239_vm6, %v466_v42, %v470_v35 }
 0x2f9   : > { %v477_v46 = vpack.c.bf16 %v469_v41, %v475_v44  ;;  %v476_v47 = vpack.c.bf16 %v468_v43, %v474_v45 }
 0x2fb   : > { %753 = vmatprep.subr.msk.bf16.mxu1 %vm265_vm7, %v477_v46  ;;  %482 = vrot.lane.b32.xlu1 %v476_v47, %s815_s21  ;;  %v497_v18 = vsel %vm265_vm7, %v476_v47, 0 }
 0x2fc   : > { %479 = vrot.lane.b32.xlu0 %v476_v47, %s814_s20  ;;  %517 = vmatpush1.bf16.msra.mxu1 %v497_v18 }
 0x2ff   : > { %592 = vrot.lane.b32.xlu1 %v477_v46, %s814_s20  ;;  %754 = vmatmul.mubr.msk.bf16.vlgmr.msra.gmra.mxu1 %vm261_vm8, %v752_v13 }
 0x300   : > { %484 = vrot.lane.b32.xlu0 %v477_v46, %s815_s21  ;;  %640 = vmatprep.mubr.bf16.mxu1 %v813_v3  ;;  %v490_v3 = vld [vmem:[%s986_s2] sm:$0x3] }
 0x36d   : > { %v483_v14 = vpop.permute.xlu1 %482 }
 0x36e   : > { %v480_v19 = vpop.permute.xlu0 %479 }
 0x36f   : > { %v489_v48 = vsel %vm252_vm9, %v480_v19, %v483_v14 }
 0x370   : > { %v546_v55 = vsel %vm265_vm7, %v489_v48, 0 }
 0x371   : > { %v593_v49 = vpop.permute.xlu1 %592 }
 0x372   : > { %v594_v50 = vsel %vm364_vm10, %v480_v19, %v593_v49  ;;  %v485_v51 = vpop.permute.xlu0 %484 }
 0x373   : > { %v604_v52 = vsel %vm265_vm7, %v594_v50, 0  ;;  %v486_v53 = vsel %vm252_vm9, %v483_v14, %v485_v51  ;;  %v597_v54 = vsel %vm364_vm10, %v593_v49, %v485_v51 }
 0x374   : > { %755 = vmatprep.subr.msk.bf16.mxu0 %vm265_vm7, %v486_v53  ;;  %758 = vmatprep.subr.msk.bf16.mxu1 %vm265_vm7, %v597_v54 }
 0x375   : > { %566 = vmatpush1.bf16.msra.mxu0 %v546_v55  ;;  %623 = vmatpush1.bf16.msra.mxu1 %v604_v52 }
 0x378   : > { %756 = vmatmul.mubr.msk.bf16.vlgmr.msra.gmra.mxu0 %vm261_vm8, %v490_v3  ;;  %759 = vmatmul.mubr.msk.bf16.vlgmr.msra.gmra.mxu1 %vm261_vm8, %v757_v56 }
 0x3bf   : > { %v536_v57 = vpop.f32.mrf.mxu1 }
 0x3c1   : > { %v538_v58 = vpop.f32.mrf.mxu1 }
 0x3c3   : > { %v540_v59 = vpop.f32.mrf.mxu1 }
 0x3c5   : > { %v541_v60 = vpop.f32.mrf.mxu1 }
 0x438   : > { %v585_v61 = vpop.f32.mrf.mxu0  ;;  %v642_v62 = vpop.f32.mrf.mxu1 }
 0x439   : > { %v586_v63 = vadd.f32 %v585_v61, %v536_v57 }
 0x43a   : > { %v587_v1 = vpop.f32.mrf.mxu0  ;;  %v644_v2 = vpop.f32.mrf.mxu1 }
 0x43b   : > { %v649_v4 = vadd.f32 %v642_v62, %v586_v63  ;;  %v588_v5 = vadd.f32 %v587_v1, %v538_v58 }
 0x43c   : > { %v589_v6 = vpop.f32.mrf.mxu0  ;;  %v646_v7 = vpop.f32.mrf.mxu1 }
 0x43d   : > { %v650_v8 = vadd.f32 %v644_v2, %v588_v5  ;;  %v657_v9 = vmul.f32 %v649_v4, %v649_v4  ;;  %v651_v12 = vsel %vm239_vm6, %v649_v4, 0.0 }
 0x43e   : > { %v590_v10 = vpop.f32.mrf.mxu0  ;;  %v647_v11 = vpop.f32.mrf.mxu1 }
 0x43f   : > { %v652_v15 = vsel %vm239_vm6, %v650_v8, 0.0  ;;  %v658_v16 = vmul.f32 %v650_v8, %v650_v8  ;;  %v659_v20 = vsel %vm239_vm6, %v657_v9, 0.0 }
 0x440   : > { %v653_v17 = vadd.f32 %v652_v15, %v651_v12 }
 0x441   : > { %v660_v21 = vsel %vm239_vm6, %v658_v16, 0.0 }
 0x442   : > { %654 = vadd.xlane.f32.xlu0 %v653_v17  ;;  %v661_v22 = vadd.f32 %v660_v21, %v659_v20 }
 0x444   : > { %662 = vadd.xlane.f32.xlu1 %v661_v22 }
 0x4cb   : > { %v655_v23 = vpop.xlane.xlu0 %654 }
 0x4cc   : > { %v656_v24 = vmul.f32 0.00390625, %v655_v23 }
 0x4cd   : > { %v663_v25 = vpop.xlane.xlu1 %662 }
 0x4ce   : > { %v664_v26 = vmul.f32 0.00390625, %v663_v25  ;;  %v665_v27 = vmul.f32 %v656_v24, %v656_v24  ;;  %v668_v31 = vsub.f32 %v649_v4, %v656_v24  ;;  %v669_v32 = vsub.f32 %v650_v8, %v656_v24 }
 0x4d0   : > { %v666_v28 = vsub.f32 %v664_v26, %v665_v27 }
 0x4d2   : > { %v667_v29 = vmax.f32 %v666_v28, 0.0 }
 0x4d4   : > { %v670_v30 = vadd.f32 1e-05, %v667_v29 }
 0x4d6   : > { %801 = vrsqrt.f32 %v670_v30 }
 0x4e3   : > { %v802_v33 = vpop.eup %801 }
 0x4e4   : > { %v672_v34 = vmul.f32 %v802_v33, %v668_v31  ;;  %v673_v35 = vmul.f32 %v802_v33, %v669_v32 }
 0x4e6   : > { %v676_v36 = vcombine.low %v672_v34, %v673_v35 }
 0x4e8   : > { %v678_v37 = vadd.f32 %v676_v36, %v852_v0 }
 0x4ea   : > { %679 = vst [vmem:[%s170_s9] sm:$0xff] %v678_v37 }
 0x4eb PF: > { %s13_s12 = sadd.s32 1, %s809_s12  }
 0x4ec   : > { %p10_p4 = scmp.ge.s32.totalorder %s13_s12, 4  }
 0x4ee   :  { %12 = sbr.rel (!%p10_p4) target bundleno = 1 (0x1), region = 66 }

</bundles_post_ra>
